<compile_context>
chip_gen: v5e
topology: v5e:2x2
jax: 0.10.0
libtpu: 0.0.40
codegen_flags: <defaults>
</compile_context>

<pallas_src>
import jax
import jax.numpy as jnp
from jax.experimental import pallas as pl
from jax.experimental.pallas import tpu as pltpu

HIDDEN = 24
SMALL_BATCH = 1024   # below this, one grid step; launch overhead dominates anyway


def _round_up(n, m):
    return ((n + m - 1) // m) * m


def _agent_mlp_kernel(x_ref, w1_ref, b1_ref, w2_ref, b2_ref, w3_ref, b3_ref, o_ref):
    x = x_ref[...]

    # Layer 1: Linear(input_size, 24) + ReLU
    h1 = jnp.dot(x, w1_ref[...], preferred_element_type=jnp.float32) + b1_ref[...]
    h1 = jnp.maximum(h1, 0.0)

    # Layer 2: Linear(24, 24) + ReLU
    h2 = jnp.dot(h1, w2_ref[...], preferred_element_type=jnp.float32) + b2_ref[...]
    h2 = jnp.maximum(h2, 0.0)

    # Layer 3: Linear(24, output_size)  (no activation)
    out = jnp.dot(h2, w3_ref[...], preferred_element_type=jnp.float32) + b3_ref[...]

    o_ref[...] = out.astype(o_ref.dtype)


def _choose_tile(B, tile_b):
    """Pick a batch tile: multiple of 8 sublanes, large to amortize per-step
    overhead, but with >= 2 grid steps for large batches (v7x megacore)."""
    b8 = _round_up(B, 8)
    if b8 <= SMALL_BATCH:
        return b8                                   # single grid step
    half = _round_up(-(-B // 2), 8)                 # ceil(B/2), 8-aligned
    return max(8, _round_up(min(tile_b, half), 8))  # >= 2 steps guaranteed


def agent_forward(x, params, *, tile_b=2048):
    """Run the Agent MLP forward pass as a single batch-tiled Pallas TPU kernel.

    x: (B, input_size) float32
    params: dict with w1 (in,24), b1 (1,24), w2 (24,24), b2 (1,24),
            w3 (24,out), b3 (1,out)  -- weights already transposed to (in, out).
    """
    w1, b1 = params["w1"], params["b1"]
    w2, b2 = params["w2"], params["b2"]
    w3, b3 = params["w3"], params["b3"]

    B, in_features = x.shape
    out_features = w3.shape[1]

    tb = _choose_tile(B, tile_b)
    grid = (pl.cdiv(B, tb),)   # ragged last tile handled by Pallas write masking

    # Weights / biases: full blocks, same block every grid step (stay resident).
    full2d = lambda a: pl.BlockSpec(a.shape, lambda i: (0, 0))

    flops = 2 * B * (in_features * HIDDEN + HIDDEN * HIDDEN + HIDDEN * out_features)
    bytes_accessed = 4 * (x.size + B * out_features + w1.size + b1.size
                          + w2.size + b2.size + w3.size + b3.size)

    out = pl.pallas_call(
        _agent_mlp_kernel,
        out_shape=jax.ShapeDtypeStruct((B, out_features), jnp.float32),
        grid=grid,
        in_specs=[
            pl.BlockSpec((tb, in_features), lambda i: (i, 0)),   # x: batch-tiled
            full2d(w1), full2d(b1),
            full2d(w2), full2d(b2),
            full2d(w3), full2d(b3),
        ],
        out_specs=pl.BlockSpec((tb, out_features), lambda i: (i, 0)),
        compiler_params=pltpu.CompilerParams(
            dimension_semantics=("parallel",),
        ),
        cost_estimate=pl.CostEstimate(
            flops=flops, transcendentals=0, bytes_accessed=bytes_accessed),
    )(x, w1, b1, w2, b2, w3, b3)

    return out


def init_agent_params(key, input_size, output_size, hidden=HIDDEN):
    """Deterministic synthetic parameters matching nn.Linear init/shapes.

    torch's nn.Linear(in, out) has weight (out, in) and bias (out,); we store
    the transposed weight (in, out) so the kernel does x @ W directly.
    """
    k1, k2, k3, k4, k5, k6 = jax.random.split(key, 6)

    def linear(kw, kb, fan_in, fan_out):
        bound = 1.0 / jnp.sqrt(float(fan_in))
        w = jax.random.uniform(kw, (fan_in, fan_out), jnp.float32, -bound, bound)
        b = jax.random.uniform(kb, (1, fan_out), jnp.float32, -bound, bound)
        return w, b

    w1, b1 = linear(k1, k2, input_size, hidden)
    w2, b2 = linear(k3, k4, hidden, hidden)
    w3, b3 = linear(k5, k6, hidden, output_size)
    return {"w1": w1, "b1": b1, "w2": w2, "b2": b2, "w3": w3, "b3": b3}


def _reference_forward(x, p):
    h1 = jnp.maximum(x @ p["w1"] + p["b1"], 0.0)
    h2 = jnp.maximum(h1 @ p["w2"] + p["b2"], 0.0)
    return h2 @ p["w3"] + p["b3"]


if __name__ == "__main__":
    input_size = 16
    output_size = 4
    batch = 200          # small batch -> single grid step, no padding anywhere

    key = jax.random.PRNGKey(0)
    kx, kp = jax.random.split(key)

    x = jax.random.normal(kx, (batch, input_size), dtype=jnp.float32)
    params = init_agent_params(kp, input_size, output_size)

    out = agent_forward(x, params)
    out = jax.block_until_ready(out)

    # Also exercise the multi-step (ragged last tile) path at a larger batch.
    x_big = jax.random.normal(kx, (3000, input_size), dtype=jnp.float32)
    out_big = jax.block_until_ready(agent_forward(x_big, params))

    ref = _reference_forward(x, params)
    ref_big = _reference_forward(x_big, params)
    assert out.shape == (batch, output_size)
    assert out_big.shape == (3000, output_size)
    assert jnp.allclose(out, ref, atol=1e-4, rtol=1e-4), "mismatch vs reference"
    assert jnp.allclose(out_big, ref_big, atol=1e-4, rtol=1e-4), "mismatch vs reference (big)"

    # TODO(synk): epsilon-greedy act(), replay memory, and target updates are
    # host-side RL bookkeeping, not part of the nn.Module forward -> not ported.
    print("KERNEL_OK")
</pallas_src>

<mosaic_0001>
module attributes {stable_mosaic.version = 11 : i64} {
  func.func @_agent_mlp_kernel(%arg0: i32, %arg1: memref<200x16xf32, #tpu.memory_space<vmem>>, %arg2: memref<16x24xf32, #tpu.memory_space<vmem>>, %arg3: memref<1x24xf32, #tpu.memory_space<vmem>>, %arg4: memref<24x24xf32, #tpu.memory_space<vmem>>, %arg5: memref<1x24xf32, #tpu.memory_space<vmem>>, %arg6: memref<24x4xf32, #tpu.memory_space<vmem>>, %arg7: memref<1x4xf32, #tpu.memory_space<vmem>>, %arg8: memref<200x4xf32, #tpu.memory_space<vmem>>) attributes {dimension_semantics = [#tpu.dimension_semantics<parallel>], iteration_bounds = array<i64: 1>, scalar_prefetch = 0 : i64, scratch_operands = 0 : i64, tpu.core_type = #tpu.core_type<tc>, window_params = [{transform_indices = @transform_0, window_bounds = array<i64: 200, 16>}, {pipeline_mode = #tpu.pipeline_mode<synchronous>, transform_indices = @transform_1, window_bounds = array<i64: 16, 24>}, {pipeline_mode = #tpu.pipeline_mode<synchronous>, transform_indices = @transform_2, window_bounds = array<i64: 1, 24>}, {pipeline_mode = #tpu.pipeline_mode<synchronous>, transform_indices = @transform_3, window_bounds = array<i64: 24, 24>}, {pipeline_mode = #tpu.pipeline_mode<synchronous>, transform_indices = @transform_4, window_bounds = array<i64: 1, 24>}, {pipeline_mode = #tpu.pipeline_mode<synchronous>, transform_indices = @transform_5, window_bounds = array<i64: 24, 4>}, {pipeline_mode = #tpu.pipeline_mode<synchronous>, transform_indices = @transform_6, window_bounds = array<i64: 1, 4>}, {transform_indices = @transform_7, window_bounds = array<i64: 200, 4>}]} {
    %c0 = arith.constant 0 : index
    %c0_0 = arith.constant 0 : index
    %0 = vector.load %arg1[%c0, %c0_0] : memref<200x16xf32, #tpu.memory_space<vmem>>, vector<200x16xf32>
    %c0_1 = arith.constant 0 : index
    %c0_2 = arith.constant 0 : index
    %1 = vector.load %arg2[%c0_1, %c0_2] : memref<16x24xf32, #tpu.memory_space<vmem>>, vector<16x24xf32>
    %cst = arith.constant dense<0.000000e+00> : vector<200x24xf32>
    %2 = tpu.matmul %0, %1, %cst {dimension_numbers = #tpu.dot_dimension_numbers<[1], [0], [0], [1], [0, 0, 1, 1], [], []>} : vector<200x16xf32>, vector<16x24xf32>, vector<200x24xf32> -> vector<200x24xf32>
    %c0_3 = arith.constant 0 : index
    %c0_4 = arith.constant 0 : index
    %3 = vector.load %arg3[%c0_3, %c0_4] : memref<1x24xf32, #tpu.memory_space<vmem>>, vector<1x24xf32>
    %4 = vector.broadcast %3 : vector<1x24xf32> to vector<200x24xf32>
    %5 = arith.addf %2, %4 : vector<200x24xf32>
    %cst_5 = arith.constant 0.000000e+00 : f32
    %6 = vector.broadcast %cst_5 : f32 to vector<200x24xf32>
    %7 = arith.maximumf %5, %6 : vector<200x24xf32>
    %c0_6 = arith.constant 0 : index
    %c0_7 = arith.constant 0 : index
    %8 = vector.load %arg4[%c0_6, %c0_7] : memref<24x24xf32, #tpu.memory_space<vmem>>, vector<24x24xf32>
    %cst_8 = arith.constant dense<0.000000e+00> : vector<200x24xf32>
    %9 = tpu.matmul %7, %8, %cst_8 {dimension_numbers = #tpu.dot_dimension_numbers<[1], [0], [0], [1], [0, 0, 1, 1], [], []>} : vector<200x24xf32>, vector<24x24xf32>, vector<200x24xf32> -> vector<200x24xf32>
    %c0_9 = arith.constant 0 : index
    %c0_10 = arith.constant 0 : index
    %10 = vector.load %arg5[%c0_9, %c0_10] : memref<1x24xf32, #tpu.memory_space<vmem>>, vector<1x24xf32>
    %11 = vector.broadcast %10 : vector<1x24xf32> to vector<200x24xf32>
    %12 = arith.addf %9, %11 : vector<200x24xf32>
    %cst_11 = arith.constant 0.000000e+00 : f32
    %13 = vector.broadcast %cst_11 : f32 to vector<200x24xf32>
    %14 = arith.maximumf %12, %13 : vector<200x24xf32>
    %c0_12 = arith.constant 0 : index
    %c0_13 = arith.constant 0 : index
    %15 = vector.load %arg6[%c0_12, %c0_13] : memref<24x4xf32, #tpu.memory_space<vmem>>, vector<24x4xf32>
    %cst_14 = arith.constant dense<0.000000e+00> : vector<200x4xf32>
    %16 = tpu.matmul %14, %15, %cst_14 {dimension_numbers = #tpu.dot_dimension_numbers<[1], [0], [0], [1], [0, 0, 1, 1], [], []>} : vector<200x24xf32>, vector<24x4xf32>, vector<200x4xf32> -> vector<200x4xf32>
    %c0_15 = arith.constant 0 : index
    %c0_16 = arith.constant 0 : index
    %17 = vector.load %arg7[%c0_15, %c0_16] : memref<1x4xf32, #tpu.memory_space<vmem>>, vector<1x4xf32>
    %18 = vector.broadcast %17 : vector<1x4xf32> to vector<200x4xf32>
    %19 = arith.addf %16, %18 : vector<200x4xf32>
    %c0_17 = arith.constant 0 : index
    %c0_18 = arith.constant 0 : index
    %20 = vector.load %arg8[%c0_17, %c0_18] : memref<200x4xf32, #tpu.memory_space<vmem>>, vector<200x4xf32>
    tpu.vector_store %arg8[%c0_17, %c0_18], %19 {strides = array<i32>} : memref<200x4xf32, #tpu.memory_space<vmem>>, vector<200x4xf32>,
    return
  }
  func.func @transform_0(%arg0: i32) -> (i32, i32) {
    %c0_i32 = arith.constant 0 : i32
    %c0_i32_0 = arith.constant 0 : i32
    return %arg0, %c0_i32 : i32, i32
  }
  func.func @transform_1(%arg0: i32) -> (i32, i32) {
    %c0_i32 = arith.constant 0 : i32
    %c0_i32_0 = arith.constant 0 : i32
    %c0_i32_1 = arith.constant 0 : i32
    return %c0_i32, %c0_i32_0 : i32, i32
  }
  func.func @transform_2(%arg0: i32) -> (i32, i32) {
    %c0_i32 = arith.constant 0 : i32
    %c0_i32_0 = arith.constant 0 : i32
    %c0_i32_1 = arith.constant 0 : i32
    return %c0_i32, %c0_i32_0 : i32, i32
  }
  func.func @transform_3(%arg0: i32) -> (i32, i32) {
    %c0_i32 = arith.constant 0 : i32
    %c0_i32_0 = arith.constant 0 : i32
    %c0_i32_1 = arith.constant 0 : i32
    return %c0_i32, %c0_i32_0 : i32, i32
  }
  func.func @transform_4(%arg0: i32) -> (i32, i32) {
    %c0_i32 = arith.constant 0 : i32
    %c0_i32_0 = arith.constant 0 : i32
    %c0_i32_1 = arith.constant 0 : i32
    return %c0_i32, %c0_i32_0 : i32, i32
  }
  func.func @transform_5(%arg0: i32) -> (i32, i32) {
    %c0_i32 = arith.constant 0 : i32
    %c0_i32_0 = arith.constant 0 : i32
    %c0_i32_1 = arith.constant 0 : i32
    return %c0_i32, %c0_i32_0 : i32, i32
  }
  func.func @transform_6(%arg0: i32) -> (i32, i32) {
    %c0_i32 = arith.constant 0 : i32
    %c0_i32_0 = arith.constant 0 : i32
    %c0_i32_1 = arith.constant 0 : i32
    return %c0_i32, %c0_i32_0 : i32, i32
  }
  func.func @transform_7(%arg0: i32) -> (i32, i32) {
    %c0_i32 = arith.constant 0 : i32
    %c0_i32_0 = arith.constant 0 : i32
    return %arg0, %c0_i32 : i32, i32
  }
}

</mosaic_0001>

<bundles_post_ra>
// kernel: tpu_custom_call.1
= control target key start
LH: loop header
LB: loop body
LE: loop exit
PB: predicated region body
PF: predicated region fallthrough
CT: control target
= control target key end

     0   :  { %vm57_vm0 = vcmask 130048   ;;  %vm257_vm1 = vcmask 195584   ;;  %vm624_vm2 = vcmask 31744   ;;  %s1144_s1 = inlined_call_operand.vmem [shape: f32[16,24], index: 1, kind: input, shape index: {}]   ;;  %s1145_s0 = inlined_call_operand.vmem [shape: f32[200,16], index: 0, kind: input, shape index: {}]   ;;  %s1146_s2 = inlined_call_operand.vmem [shape: f32[1,24], index: 2, kind: input, shape index: {}]   ;;  %s1147_s3 = inlined_call_operand.vmem [shape: f32[24,24], index: 3, kind: input, shape index: {}]   ;;  %s1148_s4 = inlined_call_operand.vmem [shape: f32[1,24], index: 4, kind: input, shape index: {}]   ;;  %s1149_s5 = inlined_call_operand.vmem [shape: f32[24,4], index: 5, kind: input, shape index: {}]   ;;  %s1150_s6 = inlined_call_operand.vmem [shape: f32[1,4], index: 6, kind: input, shape index: {}]   ;;  %s1151_s7 = inlined_call_operand.vmem [shape: f32[200,4], index: 7, kind: output, shape index: {}]  }
   0x1   :  { %v52_v0 = vld [vmem:[%s1144_s1 + $0x8] sm:$0xff]  ;;  %v51_v1 = vld [vmem:[%s1144_s1] sm:$0xff]  ;;  %v28_v4 = vld [vmem:[%s1145_s0 + $0x10] sm:$0xff] }
   0x2   :  { %147 = vmatpush.msra.mxu0 %v52_v0  ;;  %v26_v2 = vld [vmem:[%s1145_s0] sm:$0xff]  ;;  %729 = vmatpush.msra.mxu3 %v52_v0  ;;  %v27_v3 = vld [vmem:[%s1145_s0 + $0x8] sm:$0xff]  ;;  %v29_v5 = vld [vmem:[%s1145_s0 + $0x18] sm:$0xff] }
   0x3   :  { %v30_v6 = vld [vmem:[%s1145_s0 + $0x20] sm:$0xff]  ;;  %v31_v7 = vld [vmem:[%s1145_s0 + $0x28] sm:$0xff]  ;;  %v32_v8 = vld [vmem:[%s1145_s0 + $0x30] sm:$0xff] }
   0x4   :  { %148 = vmatpush.msra.mxu0 %v51_v1  ;;  %730 = vmatpush.msra.mxu3 %v51_v1  ;;  %v33_v9 = vld [vmem:[%s1145_s0 + $0x38] sm:$0xff]  ;;  %v34_v11 = vld [vmem:[%s1145_s0 + $0x40] sm:$0xff]  ;;  %v35_v13 = vld [vmem:[%s1145_s0 + $0x48] sm:$0xff] }
   0x5   :  { %654 = vmatmul.msk.f32.vlgmr.msra.gmra.mxu0 %vm57_vm0, %v26_v2  ;;  %v45_v10 = vld [vmem:[%s1145_s0 + $0x98] sm:$0xff]  ;;  %v46_v12 = vld [vmem:[%s1145_s0 + $0xa0] sm:$0xff]  ;;  %v47_v14 = vld [vmem:[%s1145_s0 + $0xa8] sm:$0xff] }
   0x6   :  { %673 = vmatmul.msk.f32.vlgmr.msra.gmra.mxu3 %vm57_vm0, %v45_v10  ;;  %v36_v15 = vld [vmem:[%s1145_s0 + $0x50] sm:$0xff]  ;;  %v37_v17 = vld [vmem:[%s1145_s0 + $0x58] sm:$0xff]  ;;  %v38_v20 = vld [vmem:[%s1145_s0 + $0x60] sm:$0xff] }
   0x7   :  { %v48_v16 = vld [vmem:[%s1145_s0 + $0xb0] sm:$0xff]  ;;  %v49_v18 = vld [vmem:[%s1145_s0 + $0xb8] sm:$0xff]  ;;  %v251_v21 = vld [vmem:[%s1147_s3 + $0x8] sm:$0xff] }
   0x8   :  { %v252_v19 = vld [vmem:[%s1147_s3 + $0x10] sm:$0xff]  ;;  %v250_v22 = vld [vmem:[%s1147_s3] sm:$0xff]  ;;  %v39_v24 = vld [vmem:[%s1145_s0 + $0x68] sm:$0xff] }
   0x9   :  { %346 = vmatpush.msra.mxu1 %v252_v19  ;;  %731 = vmatpush.msrb.mxu3 %v252_v19  ;;  %v50_v23 = vld [vmem:[%s1145_s0 + $0xc0] sm:$0xff]  ;;  %v40_v25 = vld [vmem:[%s1145_s0 + $0x70] sm:$0xff]  ;;  %v41_v26 = vld [vmem:[%s1145_s0 + $0x78] sm:$0xff] }
   0xa   :  { %v886_v27 = vld [vmem:[%s1146_s2] ss:$0 sm:$0xff]  ;;  %v43_v33 = vld [vmem:[%s1145_s0 + $0x88] sm:$0xff]  ;;  %v44_v37 = vld [vmem:[%s1145_s0 + $0x90] sm:$0xff] }
   0xb   :  { %347 = vmatpush.msra.mxu1 %v251_v21  ;;  %732 = vmatpush.msrb.mxu3 %v251_v21  ;;  %v42_v29 = vld [vmem:[%s1145_s0 + $0x80] sm:$0xff]  ;;  %v451_v21 = vld [vmem:[%s1149_s5 + $0x8] sm:$0xff] }
   0xd   :  { %655 = vmatmul.msk.f32.gmra.mxu0 %vm57_vm0, %v27_v3  ;;  %348 = vmatpush.msra.mxu1 %v250_v22 }
   0xe   :  { %674 = vmatmul.msk.f32.gmra.mxu3 %vm57_vm0, %v46_v12 }
   0xf   :  { %733 = vmatpush.msrb.mxu3 %v250_v22 }
  0x15   :  { %656 = vmatmul.msk.f32.gmra.mxu0 %vm57_vm0, %v28_v4 }
  0x16   :  { %675 = vmatmul.msk.f32.gmra.mxu3 %vm57_vm0, %v47_v14 }
  0x1d   :  { %657 = vmatmul.msk.f32.gmra.mxu0 %vm57_vm0, %v29_v5 }
  0x1e   :  { %676 = vmatmul.msk.f32.gmra.mxu3 %vm57_vm0, %v48_v16 }
  0x25   :  { %658 = vmatmul.msk.f32.gmra.mxu0 %vm57_vm0, %v30_v6 }
  0x26   :  { %677 = vmatmul.msk.f32.gmra.mxu3 %vm57_vm0, %v49_v18 }
  0x2d   :  { %659 = vmatmul.msk.f32.gmra.mxu0 %vm57_vm0, %v31_v7 }
  0x2e   :  { %678 = vmatmul.msk.f32.gmra.mxu3 %vm57_vm0, %v50_v23  ;;  %v450_v23 = vld [vmem:[%s1149_s5] sm:$0xff] }
  0x35   :  { %660 = vmatmul.msk.f32.gmra.mxu0 %vm57_vm0, %v32_v8 }
  0x3d   :  { %661 = vmatmul.msk.f32.gmra.mxu0 %vm57_vm0, %v33_v9 }
  0x45   :  { %662 = vmatmul.msk.f32.gmra.mxu0 %vm57_vm0, %v34_v11 }
  0x4d   :  { %663 = vmatmul.msk.f32.gmra.mxu0 %vm57_vm0, %v35_v13 }
  0x55   :  { %664 = vmatmul.msk.f32.gmra.mxu0 %vm57_vm0, %v36_v15 }
  0x5d   :  { %665 = vmatmul.msk.f32.gmra.mxu0 %vm57_vm0, %v37_v17  ;;  %v452_v17 = vld [vmem:[%s1149_s5 + $0x10] sm:$0xff] }
  0x5e   :  { %545 = vmatpush.msra.mxu2 %v452_v17  ;;  %734 = vmatpush.msra.mxu3 %v452_v17 }
  0x60   :  { %546 = vmatpush.msra.mxu2 %v451_v21  ;;  %735 = vmatpush.msra.mxu3 %v451_v21 }
  0x62   :  { %547 = vmatpush.msra.mxu2 %v450_v23  ;;  %736 = vmatpush.msra.mxu3 %v450_v23 }
  0x65   :  { %666 = vmatmul.msk.f32.gmra.mxu0 %vm57_vm0, %v38_v20 }
  0x6d   :  { %667 = vmatmul.msk.f32.gmra.mxu0 %vm57_vm0, %v39_v24 }
  0x75   :  { %668 = vmatmul.msk.f32.gmra.mxu0 %vm57_vm0, %v40_v25 }
  0x7d   :  { %669 = vmatmul.msk.f32.gmra.mxu0 %vm57_vm0, %v41_v26 }
  0x82   :  { %v150_v28 = vpop.f32.mrf.mxu0 }
  0x83   :  { %v151_v30 = vadd.f32 %v886_v27, %v150_v28 }
  0x85   :  { %v225_v31 = vmax.f32 %v151_v30, 0.0  ;;  %670 = vmatmul.msk.f32.gmra.mxu0 %vm57_vm0, %v42_v29 }
  0x87   :  { %679 = vmatmul.msk.f32.vlgmr.msra.gmra.mxu1 %vm257_vm1, %v225_v31 }
  0x89   :  { %v207_v57 = vpop.f32.mrf.mxu3 }
  0x8a   :  { %v153_v32 = vpop.f32.mrf.mxu0  ;;  %v208_v59 = vadd.f32 %v886_v27, %v207_v57 }
  0x8b   :  { %v154_v34 = vadd.f32 %v886_v27, %v153_v32 }
  0x8c   :  { %v244_v60 = vmax.f32 %v208_v59, 0.0 }
  0x8d   :  { %v226_v35 = vmax.f32 %v154_v34, 0.0  ;;  %671 = vmatmul.msk.f32.gmra.mxu0 %vm57_vm0, %v43_v33 }
  0x8e   :  { %698 = vmatmul.msk.f32.vlgmr.msrb.gmra.mxu3 %vm257_vm1, %v244_v60 }
  0x8f   :  { %680 = vmatmul.msk.f32.gmra.mxu1 %vm257_vm1, %v226_v35 }
  0x91   :  { %v210_v63 = vpop.f32.mrf.mxu3 }
  0x92   :  { %v156_v36 = vpop.f32.mrf.mxu0  ;;  %v211_v1 = vadd.f32 %v886_v27, %v210_v63 }
  0x93   :  { %v157_v38 = vadd.f32 %v886_v27, %v156_v36 }
  0x94   :  { %v245_v2 = vmax.f32 %v211_v1, 0.0 }
  0x95   :  { %v227_v39 = vmax.f32 %v157_v38, 0.0  ;;  %672 = vmatmul.msk.f32.gmra.mxu0 %vm57_vm0, %v44_v37  ;;  %v956_v37 = vld [vmem:[%s1148_s4] ss:$0 sm:$0xff] }
  0x96   :  { %699 = vmatmul.msk.f32.gmra.mxu3 %vm257_vm1, %v245_v2 }
  0x97   :  { %681 = vmatmul.msk.f32.gmra.mxu1 %vm257_vm1, %v227_v39 }
  0x99   :  { %v213_v5 = vpop.f32.mrf.mxu3 }
  0x9a   :  { %v159_v40 = vpop.f32.mrf.mxu0  ;;  %v214_v7 = vadd.f32 %v886_v27, %v213_v5 }
  0x9b   :  { %v160_v41 = vadd.f32 %v886_v27, %v159_v40 }
  0x9c   :  { %v246_v8 = vmax.f32 %v214_v7, 0.0 }
  0x9d   :  { %v228_v42 = vmax.f32 %v160_v41, 0.0 }
  0x9e   :  { %700 = vmatmul.msk.f32.gmra.mxu3 %vm257_vm1, %v246_v8 }
  0x9f   :  { %682 = vmatmul.msk.f32.gmra.mxu1 %vm257_vm1, %v228_v42 }
  0xa1   :  { %v216_v11 = vpop.f32.mrf.mxu3 }
  0xa2   :  { %v162_v43 = vpop.f32.mrf.mxu0  ;;  %v217_v13 = vadd.f32 %v886_v27, %v216_v11 }
  0xa3   :  { %v163_v44 = vadd.f32 %v886_v27, %v162_v43 }
  0xa4   :  { %v247_v14 = vmax.f32 %v217_v13, 0.0 }
  0xa5   :  { %v229_v45 = vmax.f32 %v163_v44, 0.0 }
  0xa6   :  { %701 = vmatmul.msk.f32.gmra.mxu3 %vm257_vm1, %v247_v14 }
  0xa7   :  { %683 = vmatmul.msk.f32.gmra.mxu1 %vm257_vm1, %v229_v45 }
  0xa9   :  { %v219_v18 = vpop.f32.mrf.mxu3 }
  0xaa   :  { %v165_v46 = vpop.f32.mrf.mxu0  ;;  %v220_v20 = vadd.f32 %v886_v27, %v219_v18 }
  0xab   :  { %v166_v47 = vadd.f32 %v886_v27, %v165_v46 }
  0xac   :  { %v248_v22 = vmax.f32 %v220_v20, 0.0 }
  0xad   :  { %v230_v48 = vmax.f32 %v166_v47, 0.0 }
  0xae   :  { %702 = vmatmul.msk.f32.gmra.mxu3 %vm257_vm1, %v248_v22 }
  0xaf   :  { %684 = vmatmul.msk.f32.gmra.mxu1 %vm257_vm1, %v230_v48 }
  0xb1   :  { %v222_v26 = vpop.f32.mrf.mxu3 }
  0xb2   :  { %v168_v49 = vpop.f32.mrf.mxu0  ;;  %v223_v29 = vadd.f32 %v886_v27, %v222_v26 }
  0xb3   :  { %v169_v50 = vadd.f32 %v886_v27, %v168_v49 }
  0xb4   :  { %v249_v30 = vmax.f32 %v223_v29, 0.0 }
  0xb5   :  { %v231_v51 = vmax.f32 %v169_v50, 0.0 }
  0xb6   :  { %703 = vmatmul.msk.f32.gmra.mxu3 %vm257_vm1, %v249_v30 }
  0xb7   :  { %685 = vmatmul.msk.f32.gmra.mxu1 %vm257_vm1, %v231_v51 }
  0xba   :  { %v171_v52 = vpop.f32.mrf.mxu0 }
  0xbb   :  { %v172_v53 = vadd.f32 %v886_v27, %v171_v52 }
  0xbd   :  { %v232_v54 = vmax.f32 %v172_v53, 0.0 }
  0xbf   :  { %686 = vmatmul.msk.f32.gmra.mxu1 %vm257_vm1, %v232_v54 }
  0xc2   :  { %v174_v55 = vpop.f32.mrf.mxu0 }
  0xc3   :  { %v175_v56 = vadd.f32 %v886_v27, %v174_v55 }
  0xc5   :  { %v233_v58 = vmax.f32 %v175_v56, 0.0 }
  0xc7   :  { %687 = vmatmul.msk.f32.gmra.mxu1 %vm257_vm1, %v233_v58 }
  0xca   :  { %v177_v61 = vpop.f32.mrf.mxu0 }
  0xcb   :  { %v178_v62 = vadd.f32 %v886_v27, %v177_v61 }
  0xcd   :  { %v234_v0 = vmax.f32 %v178_v62, 0.0 }
  0xcf   :  { %688 = vmatmul.msk.f32.gmra.mxu1 %vm257_vm1, %v234_v0 }
  0xd2   :  { %v180_v3 = vpop.f32.mrf.mxu0 }
  0xd3   :  { %v181_v4 = vadd.f32 %v886_v27, %v180_v3 }
  0xd5   :  { %v235_v6 = vmax.f32 %v181_v4, 0.0 }
  0xd7   :  { %689 = vmatmul.msk.f32.gmra.mxu1 %vm257_vm1, %v235_v6 }
  0xda   :  { %v183_v9 = vpop.f32.mrf.mxu0 }
  0xdb   :  { %v184_v10 = vadd.f32 %v886_v27, %v183_v9 }
  0xdd   :  { %v236_v12 = vmax.f32 %v184_v10, 0.0 }
  0xdf   :  { %690 = vmatmul.msk.f32.gmra.mxu1 %vm257_vm1, %v236_v12 }
  0xe2   :  { %v186_v15 = vpop.f32.mrf.mxu0 }
  0xe3   :  { %v187_v16 = vadd.f32 %v886_v27, %v186_v15 }
  0xe5   :  { %v237_v19 = vmax.f32 %v187_v16, 0.0 }
  0xe7   :  { %691 = vmatmul.msk.f32.gmra.mxu1 %vm257_vm1, %v237_v19 }
  0xea   :  { %v189_v24 = vpop.f32.mrf.mxu0 }
  0xeb   :  { %v190_v25 = vadd.f32 %v886_v27, %v189_v24 }
  0xed   :  { %v238_v28 = vmax.f32 %v190_v25, 0.0 }
  0xef   :  { %692 = vmatmul.msk.f32.gmra.mxu1 %vm257_vm1, %v238_v28 }
  0xf2   :  { %v192_v31 = vpop.f32.mrf.mxu0 }
  0xf3   :  { %v193_v32 = vadd.f32 %v886_v27, %v192_v31 }
  0xf5   :  { %v239_v33 = vmax.f32 %v193_v32, 0.0 }
  0xf7   :  { %693 = vmatmul.msk.f32.gmra.mxu1 %vm257_vm1, %v239_v33 }
  0xfa   :  { %v195_v34 = vpop.f32.mrf.mxu0 }
  0xfb   :  { %v196_v35 = vadd.f32 %v886_v27, %v195_v34 }
  0xfd   :  { %v240_v36 = vmax.f32 %v196_v35, 0.0 }
  0xff   :  { %694 = vmatmul.msk.f32.gmra.mxu1 %vm257_vm1, %v240_v36 }
 0x102   :  { %v198_v38 = vpop.f32.mrf.mxu0 }
 0x103   :  { %v199_v39 = vadd.f32 %v886_v27, %v198_v38 }
 0x104   :  { %v350_v40 = vpop.f32.mrf.mxu1 }
 0x105   :  { %v241_v41 = vmax.f32 %v199_v39, 0.0  ;;  %v351_v42 = vadd.f32 %v956_v37, %v350_v40 }
 0x107   :  { %v425_v43 = vmax.f32 %v351_v42, 0.0  ;;  %695 = vmatmul.msk.f32.gmra.mxu1 %vm257_vm1, %v241_v41 }
 0x109   :  { %704 = vmatmul.msk.f32.vlgmr.msra.gmra.mxu2 %vm257_vm1, %v425_v43 }
 0x10a   :  { %v201_v44 = vpop.f32.mrf.mxu0 }
 0x10b   :  { %v202_v45 = vadd.f32 %v886_v27, %v201_v44 }
 0x10c   :  { %v353_v46 = vpop.f32.mrf.mxu1 }
 0x10d   :  { %v242_v47 = vmax.f32 %v202_v45, 0.0  ;;  %v354_v48 = vadd.f32 %v956_v37, %v353_v46 }
 0x10f   :  { %v426_v49 = vmax.f32 %v354_v48, 0.0  ;;  %696 = vmatmul.msk.f32.gmra.mxu1 %vm257_vm1, %v242_v47 }
 0x111   :  { %705 = vmatmul.msk.f32.gmra.mxu2 %vm257_vm1, %v426_v49  ;;  %v407_v10 = vpop.f32.mrf.mxu3 }
 0x112   :  { %v204_v50 = vpop.f32.mrf.mxu0  ;;  %v408_v12 = vadd.f32 %v956_v37, %v407_v10 }
 0x113   :  { %v205_v51 = vadd.f32 %v886_v27, %v204_v50 }
 0x114   :  { %v356_v52 = vpop.f32.mrf.mxu1  ;;  %v444_v14 = vmax.f32 %v408_v12, 0.0 }
 0x115   :  { %v243_v53 = vmax.f32 %v205_v51, 0.0  ;;  %v357_v54 = vadd.f32 %v956_v37, %v356_v52 }
 0x116   :  { %723 = vmatmul.msk.f32.vlgmr.msra.gmra.mxu3 %vm257_vm1, %v444_v14 }
 0x117   :  { %v427_v55 = vmax.f32 %v357_v54, 0.0  ;;  %697 = vmatmul.msk.f32.gmra.mxu1 %vm257_vm1, %v243_v53  ;;  %v1013_v53 = vld [vmem:[%s1150_s6] ss:$0 sm:$0xff] }
 0x119   :  { %706 = vmatmul.msk.f32.gmra.mxu2 %vm257_vm1, %v427_v55  ;;  %v410_v16 = vpop.f32.mrf.mxu3 }
 0x11a   :  { %v411_v18 = vadd.f32 %v956_v37, %v410_v16 }
 0x11c   :  { %v359_v56 = vpop.f32.mrf.mxu1  ;;  %v445_v20 = vmax.f32 %v411_v18, 0.0 }
 0x11d   :  { %v360_v57 = vadd.f32 %v956_v37, %v359_v56 }
 0x11e   :  { %724 = vmatmul.msk.f32.gmra.mxu3 %vm257_vm1, %v445_v20 }
 0x11f   :  { %v428_v58 = vmax.f32 %v360_v57, 0.0 }
 0x121   :  { %707 = vmatmul.msk.f32.gmra.mxu2 %vm257_vm1, %v428_v58  ;;  %v413_v22 = vpop.f32.mrf.mxu3 }
 0x122   :  { %v414_v24 = vadd.f32 %v956_v37, %v413_v22 }
 0x124   :  { %v362_v59 = vpop.f32.mrf.mxu1  ;;  %v446_v26 = vmax.f32 %v414_v24, 0.0 }
 0x125   :  { %v363_v60 = vadd.f32 %v956_v37, %v362_v59 }
 0x126   :  { %725 = vmatmul.msk.f32.gmra.mxu3 %vm257_vm1, %v446_v26 }
 0x127   :  { %v429_v61 = vmax.f32 %v363_v60, 0.0 }
 0x129   :  { %708 = vmatmul.msk.f32.gmra.mxu2 %vm257_vm1, %v429_v61  ;;  %v416_v29 = vpop.f32.mrf.mxu3 }
 0x12a   :  { %v417_v31 = vadd.f32 %v956_v37, %v416_v29 }
 0x12c   :  { %v365_v27 = vpop.f32.mrf.mxu1  ;;  %v447_v33 = vmax.f32 %v417_v31, 0.0 }
 0x12d   :  { %v366_v62 = vadd.f32 %v956_v37, %v365_v27 }
 0x12e   :  { %726 = vmatmul.msk.f32.gmra.mxu3 %vm257_vm1, %v447_v33 }
 0x12f   :  { %v430_v63 = vmax.f32 %v366_v62, 0.0 }
 0x131   :  { %709 = vmatmul.msk.f32.gmra.mxu2 %vm257_vm1, %v430_v63  ;;  %v419_v35 = vpop.f32.mrf.mxu3 }
 0x132   :  { %v420_v38 = vadd.f32 %v956_v37, %v419_v35 }
 0x134   :  { %v368_v0 = vpop.f32.mrf.mxu1  ;;  %v448_v40 = vmax.f32 %v420_v38, 0.0 }
 0x135   :  { %v369_v1 = vadd.f32 %v956_v37, %v368_v0 }
 0x136   :  { %727 = vmatmul.msk.f32.gmra.mxu3 %vm257_vm1, %v448_v40 }
 0x137   :  { %v431_v2 = vmax.f32 %v369_v1, 0.0 }
 0x139   :  { %710 = vmatmul.msk.f32.gmra.mxu2 %vm257_vm1, %v431_v2  ;;  %v422_v42 = vpop.f32.mrf.mxu3 }
 0x13a   :  { %v423_v44 = vadd.f32 %v956_v37, %v422_v42 }
 0x13c   :  { %v371_v3 = vpop.f32.mrf.mxu1  ;;  %v449_v46 = vmax.f32 %v423_v44, 0.0 }
 0x13d   :  { %v372_v4 = vadd.f32 %v956_v37, %v371_v3 }
 0x13e   :  { %728 = vmatmul.msk.f32.gmra.mxu3 %vm257_vm1, %v449_v46 }
 0x13f   :  { %v432_v5 = vmax.f32 %v372_v4, 0.0 }
 0x141   :  { %711 = vmatmul.msk.f32.gmra.mxu2 %vm257_vm1, %v432_v5 }
 0x144   :  { %v374_v6 = vpop.f32.mrf.mxu1 }
 0x145   :  { %v375_v7 = vadd.f32 %v956_v37, %v374_v6 }
 0x147   :  { %v433_v8 = vmax.f32 %v375_v7, 0.0 }
 0x149   :  { %712 = vmatmul.msk.f32.gmra.mxu2 %vm257_vm1, %v433_v8 }
 0x14c   :  { %v377_v9 = vpop.f32.mrf.mxu1 }
 0x14d   :  { %v378_v11 = vadd.f32 %v956_v37, %v377_v9 }
 0x14f   :  { %v434_v13 = vmax.f32 %v378_v11, 0.0 }
 0x151   :  { %713 = vmatmul.msk.f32.gmra.mxu2 %vm257_vm1, %v434_v13 }
 0x154   :  { %v380_v15 = vpop.f32.mrf.mxu1 }
 0x155   :  { %v381_v17 = vadd.f32 %v956_v37, %v380_v15 }
 0x157   :  { %v435_v19 = vmax.f32 %v381_v17, 0.0 }
 0x159   :  { %714 = vmatmul.msk.f32.gmra.mxu2 %vm257_vm1, %v435_v19 }
 0x15c   :  { %v383_v21 = vpop.f32.mrf.mxu1 }
 0x15d   :  { %v384_v23 = vadd.f32 %v956_v37, %v383_v21 }
 0x15f   :  { %v436_v25 = vmax.f32 %v384_v23, 0.0 }
 0x161   :  { %715 = vmatmul.msk.f32.gmra.mxu2 %vm257_vm1, %v436_v25 }
 0x164   :  { %v386_v28 = vpop.f32.mrf.mxu1 }
 0x165   :  { %v387_v30 = vadd.f32 %v956_v37, %v386_v28 }
 0x167   :  { %v437_v32 = vmax.f32 %v387_v30, 0.0 }
 0x169   :  { %716 = vmatmul.msk.f32.gmra.mxu2 %vm257_vm1, %v437_v32 }
 0x16c   :  { %v389_v34 = vpop.f32.mrf.mxu1 }
 0x16d   :  { %v390_v36 = vadd.f32 %v956_v37, %v389_v34 }
 0x16f   :  { %v438_v39 = vmax.f32 %v390_v36, 0.0 }
 0x171   :  { %717 = vmatmul.msk.f32.gmra.mxu2 %vm257_vm1, %v438_v39 }
 0x174   :  { %v392_v41 = vpop.f32.mrf.mxu1 }
 0x175   :  { %v393_v43 = vadd.f32 %v956_v37, %v392_v41 }
 0x177   :  { %v439_v45 = vmax.f32 %v393_v43, 0.0 }
 0x179   :  { %718 = vmatmul.msk.f32.gmra.mxu2 %vm257_vm1, %v439_v45 }
 0x17c   :  { %v395_v47 = vpop.f32.mrf.mxu1 }
 0x17d   :  { %v396_v48 = vadd.f32 %v956_v37, %v395_v47 }
 0x17f   :  { %v440_v49 = vmax.f32 %v396_v48, 0.0 }
 0x181   :  { %719 = vmatmul.msk.f32.gmra.mxu2 %vm257_vm1, %v440_v49 }
 0x184   :  { %v398_v50 = vpop.f32.mrf.mxu1 }
 0x185   :  { %v399_v51 = vadd.f32 %v956_v37, %v398_v50 }
 0x187   :  { %v441_v52 = vmax.f32 %v399_v51, 0.0 }
 0x189   :  { %720 = vmatmul.msk.f32.gmra.mxu2 %vm257_vm1, %v441_v52 }
 0x18c   :  { %v401_v54 = vpop.f32.mrf.mxu1  ;;  %v549_v55 = vpop.f32.mrf.mxu2 }
 0x18d   :  { %v402_v56 = vadd.f32 %v956_v37, %v401_v54  ;;  %v550_v57 = vadd.f32 %v1013_v53, %v549_v55 }
 0x18f   :  { %v442_v58 = vmax.f32 %v402_v56, 0.0  ;;  %625 = vst.msk [vmem:[%s1151_s7] sm:$0xff] %vm624_vm2, %v550_v57 }
 0x191   :  { %721 = vmatmul.msk.f32.gmra.mxu2 %vm257_vm1, %v442_v58 }
 0x194   :  { %v404_v59 = vpop.f32.mrf.mxu1  ;;  %v552_v60 = vpop.f32.mrf.mxu2 }
 0x195   :  { %v405_v61 = vadd.f32 %v956_v37, %v404_v59  ;;  %v553_v27 = vadd.f32 %v1013_v53, %v552_v60 }
 0x197   :  { %v443_v62 = vmax.f32 %v405_v61, 0.0  ;;  %626 = vst.msk [vmem:[%s1151_s7 + $0x8] sm:$0xff] %vm624_vm2, %v553_v27 }
 0x199   :  { %722 = vmatmul.msk.f32.gmra.mxu2 %vm257_vm1, %v443_v62  ;;  %v606_v13 = vpop.f32.mrf.mxu3 }
 0x19a   :  { %v607_v15 = vadd.f32 %v1013_v53, %v606_v13 }
 0x19c   :  { %v555_v63 = vpop.f32.mrf.mxu2  ;;  %644 = vst.msk [vmem:[%s1151_s7 + $0x98] sm:$0xff] %vm624_vm2, %v607_v15 }
 0x19d   :  { %v556_v0 = vadd.f32 %v1013_v53, %v555_v63 }
 0x19f   :  { %627 = vst.msk [vmem:[%s1151_s7 + $0x10] sm:$0xff] %vm624_vm2, %v556_v0 }
 0x1a1   :  { %v609_v17 = vpop.f32.mrf.mxu3 }
 0x1a2   :  { %v610_v19 = vadd.f32 %v1013_v53, %v609_v17 }
 0x1a4   :  { %v558_v1 = vpop.f32.mrf.mxu2  ;;  %645 = vst.msk [vmem:[%s1151_s7 + $0xa0] sm:$0xff] %vm624_vm2, %v610_v19 }
 0x1a5   :  { %v559_v37 = vadd.f32 %v1013_v53, %v558_v1 }
 0x1a7   :  { %628 = vst.msk [vmem:[%s1151_s7 + $0x18] sm:$0xff] %vm624_vm2, %v559_v37 }
 0x1a9   :  { %v612_v21 = vpop.f32.mrf.mxu3 }
 0x1aa   :  { %v613_v23 = vadd.f32 %v1013_v53, %v612_v21 }
 0x1ac   :  { %v561_v2 = vpop.f32.mrf.mxu2  ;;  %646 = vst.msk [vmem:[%s1151_s7 + $0xa8] sm:$0xff] %vm624_vm2, %v613_v23 }
 0x1ad   :  { %v562_v3 = vadd.f32 %v1013_v53, %v561_v2 }
 0x1af   :  { %629 = vst.msk [vmem:[%s1151_s7 + $0x20] sm:$0xff] %vm624_vm2, %v562_v3 }
 0x1b1   :  { %v615_v25 = vpop.f32.mrf.mxu3 }
 0x1b2   :  { %v616_v28 = vadd.f32 %v1013_v53, %v615_v25 }
 0x1b4   :  { %v564_v4 = vpop.f32.mrf.mxu2  ;;  %647 = vst.msk [vmem:[%s1151_s7 + $0xb0] sm:$0xff] %vm624_vm2, %v616_v28 }
 0x1b5   :  { %v565_v5 = vadd.f32 %v1013_v53, %v564_v4 }
 0x1b7   :  { %630 = vst.msk [vmem:[%s1151_s7 + $0x28] sm:$0xff] %vm624_vm2, %v565_v5 }
 0x1b9   :  { %v618_v30 = vpop.f32.mrf.mxu3 }
 0x1ba   :  { %v619_v32 = vadd.f32 %v1013_v53, %v618_v30 }
 0x1bc   :  { %v567_v6 = vpop.f32.mrf.mxu2  ;;  %648 = vst.msk [vmem:[%s1151_s7 + $0xb8] sm:$0xff] %vm624_vm2, %v619_v32 }
 0x1bd   :  { %v568_v7 = vadd.f32 %v1013_v53, %v567_v6 }
 0x1bf   :  { %631 = vst.msk [vmem:[%s1151_s7 + $0x30] sm:$0xff] %vm624_vm2, %v568_v7 }
 0x1c1   :  { %v621_v34 = vpop.f32.mrf.mxu3 }
 0x1c2   :  { %v622_v36 = vadd.f32 %v1013_v53, %v621_v34 }
 0x1c4   :  { %v570_v8 = vpop.f32.mrf.mxu2  ;;  %649 = vst.msk [vmem:[%s1151_s7 + $0xc0] sm:$0xff] %vm624_vm2, %v622_v36 }
 0x1c5   :  { %v571_v9 = vadd.f32 %v1013_v53, %v570_v8 }
 0x1c7   :  { %632 = vst.msk [vmem:[%s1151_s7 + $0x38] sm:$0xff] %vm624_vm2, %v571_v9 }
 0x1cc   :  { %v573_v10 = vpop.f32.mrf.mxu2 }
 0x1cd   :  { %v574_v11 = vadd.f32 %v1013_v53, %v573_v10 }
 0x1cf   :  { %633 = vst.msk [vmem:[%s1151_s7 + $0x40] sm:$0xff] %vm624_vm2, %v574_v11 }
 0x1d4   :  { %v576_v12 = vpop.f32.mrf.mxu2 }
 0x1d5   :  { %v577_v14 = vadd.f32 %v1013_v53, %v576_v12 }
 0x1d7   :  { %634 = vst.msk [vmem:[%s1151_s7 + $0x48] sm:$0xff] %vm624_vm2, %v577_v14 }
 0x1dc   :  { %v579_v16 = vpop.f32.mrf.mxu2 }
 0x1dd   :  { %v580_v18 = vadd.f32 %v1013_v53, %v579_v16 }
 0x1df   :  { %635 = vst.msk [vmem:[%s1151_s7 + $0x50] sm:$0xff] %vm624_vm2, %v580_v18 }
 0x1e4   :  { %v582_v20 = vpop.f32.mrf.mxu2 }
 0x1e5   :  { %v583_v22 = vadd.f32 %v1013_v53, %v582_v20 }
 0x1e7   :  { %636 = vst.msk [vmem:[%s1151_s7 + $0x58] sm:$0xff] %vm624_vm2, %v583_v22 }
 0x1ec   :  { %v585_v24 = vpop.f32.mrf.mxu2 }
 0x1ed   :  { %v586_v26 = vadd.f32 %v1013_v53, %v585_v24 }
 0x1ef   :  { %637 = vst.msk [vmem:[%s1151_s7 + $0x60] sm:$0xff] %vm624_vm2, %v586_v26 }
 0x1f4   :  { %v588_v29 = vpop.f32.mrf.mxu2 }
 0x1f5   :  { %v589_v31 = vadd.f32 %v1013_v53, %v588_v29 }
 0x1f7   :  { %638 = vst.msk [vmem:[%s1151_s7 + $0x68] sm:$0xff] %vm624_vm2, %v589_v31 }
 0x1fc   :  { %v591_v33 = vpop.f32.mrf.mxu2 }
 0x1fd   :  { %v592_v35 = vadd.f32 %v1013_v53, %v591_v33 }
 0x1ff   :  { %639 = vst.msk [vmem:[%s1151_s7 + $0x70] sm:$0xff] %vm624_vm2, %v592_v35 }
 0x204   :  { %v594_v38 = vpop.f32.mrf.mxu2 }
 0x205   :  { %v595_v39 = vadd.f32 %v1013_v53, %v594_v38 }
 0x207   :  { %640 = vst.msk [vmem:[%s1151_s7 + $0x78] sm:$0xff] %vm624_vm2, %v595_v39 }
 0x20c   :  { %v597_v40 = vpop.f32.mrf.mxu2 }
 0x20d   :  { %v598_v41 = vadd.f32 %v1013_v53, %v597_v40 }
 0x20f   :  { %641 = vst.msk [vmem:[%s1151_s7 + $0x80] sm:$0xff] %vm624_vm2, %v598_v41 }
 0x214   :  { %v600_v42 = vpop.f32.mrf.mxu2 }
 0x215   :  { %v601_v43 = vadd.f32 %v1013_v53, %v600_v42 }
 0x217   :  { %642 = vst.msk [vmem:[%s1151_s7 + $0x88] sm:$0xff] %vm624_vm2, %v601_v43 }
 0x21c   :  { %v603_v44 = vpop.f32.mrf.mxu2 }
 0x21d   :  { %v604_v45 = vadd.f32 %v1013_v53, %v603_v44 }
 0x21f   :  { %643 = vst.msk [vmem:[%s1151_s7 + $0x90] sm:$0xff] %vm624_vm2, %v604_v45 }

</bundles_post_ra>
